<compile_context>
chip_gen: v7x
topology: tpu7x:2x2x1
jax: 0.10.0
libtpu: 0.0.40
codegen_flags: <defaults>
</compile_context>

<pallas_src>
import jax
import jax.numpy as jnp
from jax import lax
from jax.experimental import pallas as pl
from jax.experimental.pallas import tpu as pltpu


# ---------------------------------------------------------------------------
# helpers
# ---------------------------------------------------------------------------
def _softmax_rows(scores):
    """Row softmax; approx EUP reciprocal + one Newton step (~1e-8 rel err)."""
    m = jnp.max(scores, axis=-1, keepdims=True)
    e = jnp.exp(scores - m)
    s = jnp.sum(e, axis=-1, keepdims=True)
    r = pl.reciprocal(s, approx=True)
    r = r * (2.0 - s * r)                  # Newton refinement
    return e * r


def _pick_block_m(m):
    """Largest multiple-of-8 divisor of m up to 512, else the full extent."""
    for cand in (512, 256, 128, 64, 32, 16, 8):
        if cand <= m and m % cand == 0:
            return cand
    return m


# ---------------------------------------------------------------------------
# single-step kernel (matches ActionModel.forward exactly)
# ---------------------------------------------------------------------------
def action_step_kernel(state_ref, frame_ref,
                       w1_ref, b1_ref, wih_ref, bih_ref, whh_ref, bhh_ref,
                       w2_ref, b2_ref, w3_ref, b3_ref,
                       z_out_ref, probs_out_ref):
    h = jnp.tanh(jnp.dot(frame_ref[...], w1_ref[...],
                         preferred_element_type=jnp.float32) + b1_ref[...])
    z = jnp.tanh(jnp.dot(h, wih_ref[...], preferred_element_type=jnp.float32)
                 + jnp.dot(state_ref[...], whh_ref[...],
                           preferred_element_type=jnp.float32)
                 + (bih_ref[...] + bhh_ref[...]))
    zz = jnp.tanh(jnp.dot(z, w2_ref[...],
                          preferred_element_type=jnp.float32) + b2_ref[...])
    scores = jnp.dot(zz, w3_ref[...],
                     preferred_element_type=jnp.float32) + b3_ref[...]
    z_out_ref[...] = z.astype(z_out_ref.dtype)
    probs_out_ref[...] = _softmax_rows(scores).astype(probs_out_ref.dtype)


def action_model_forward(state, frame, params):
    """One ActionModel.forward step: returns (z, softmax(scores))."""
    B, H = state.shape
    A = params["w3"].shape[1]
    vmem = pl.BlockSpec(memory_space=pltpu.MemorySpace.VMEM)
    args = (state, frame,
            params["w1"], params["b1"],
            params["w_ih"], params["b_ih"], params["w_hh"], params["b_hh"],
            params["w2"], params["b2"], params["w3"], params["b3"])
    return pl.pallas_call(
        action_step_kernel,
        out_shape=(jax.ShapeDtypeStruct((B, H), jnp.float32),
                   jax.ShapeDtypeStruct((B, A), jnp.float32)),
        in_specs=[vmem] * len(args),
        out_specs=(vmem, vmem),
    )(*args)


# ---------------------------------------------------------------------------
# rollout phase 1: batched pre-projection  h = tanh(x @ w1 + b1)
# ---------------------------------------------------------------------------
def preproj_kernel(x_ref, w1_ref, b1_ref, h_ref):
    h_ref[...] = jnp.tanh(
        jnp.dot(x_ref[...], w1_ref[...],
                preferred_element_type=jnp.float32) + b1_ref[...]
    ).astype(h_ref.dtype)


def batched_preproj(x_flat, w1, b1):
    M, O = x_flat.shape
    H = w1.shape[1]
    bm = _pick_block_m(M)
    return pl.pallas_call(
        preproj_kernel,
        grid=(M // bm,),
        in_specs=[pl.BlockSpec((bm, O), lambda i: (i, 0)),
                  pl.BlockSpec((O, H), lambda i: (0, 0)),
                  pl.BlockSpec((1, H), lambda i: (0, 0))],
        out_specs=pl.BlockSpec((bm, H), lambda i: (i, 0)),
        out_shape=jax.ShapeDtypeStruct((M, H), jnp.float32),
        compiler_params=pltpu.CompilerParams(
            dimension_semantics=("parallel",)),
    )(x_flat, w1, b1)


# ---------------------------------------------------------------------------
# rollout phase 2: minimal serial recurrence (only the sequential matmul)
# ---------------------------------------------------------------------------
def recurrence_kernel(state0_ref, h_all_ref, wih_ref, bih_ref, whh_ref, bhh_ref,
                      z_all_ref):
    T = h_all_ref.shape[0]
    wih = wih_ref[...]
    whh = whh_ref[...]
    b = bih_ref[...] + bhh_ref[...]

    def body(t, z):
        z_new = jnp.tanh(
            jnp.dot(h_all_ref[t], wih, preferred_element_type=jnp.float32)
            + jnp.dot(z, whh, preferred_element_type=jnp.float32) + b)
        z_all_ref[t] = z_new.astype(z_all_ref.dtype)
        return z_new

    lax.fori_loop(0, T, body, state0_ref[...], unroll=True)


def serial_recurrence(state0, h_all, w_ih, b_ih, w_hh, b_hh):
    T, B, H = h_all.shape
    vmem = pl.BlockSpec(memory_space=pltpu.MemorySpace.VMEM)
    return pl.pallas_call(
        recurrence_kernel,
        out_shape=jax.ShapeDtypeStruct((T, B, H), jnp.float32),
        in_specs=[vmem] * 6,
        out_specs=vmem,
    )(state0, h_all, w_ih, b_ih, w_hh, b_hh)


# ---------------------------------------------------------------------------
# rollout phase 3: batched head  softmax(tanh(z @ w2 + b2) @ w3 + b3)
# ---------------------------------------------------------------------------
def head_kernel(z_ref, w2_ref, b2_ref, w3_ref, b3_ref, probs_ref):
    zz = jnp.tanh(jnp.dot(z_ref[...], w2_ref[...],
                          preferred_element_type=jnp.float32) + b2_ref[...])
    scores = jnp.dot(zz, w3_ref[...],
                     preferred_element_type=jnp.float32) + b3_ref[...]
    probs_ref[...] = _softmax_rows(scores).astype(probs_ref.dtype)


def batched_head(z_flat, w2, b2, w3, b3):
    M, H = z_flat.shape
    A = w3.shape[1]
    bm = _pick_block_m(M)
    return pl.pallas_call(
        head_kernel,
        grid=(M // bm,),
        in_specs=[pl.BlockSpec((bm, H), lambda i: (i, 0)),
                  pl.BlockSpec((H, H), lambda i: (0, 0)),
                  pl.BlockSpec((1, H), lambda i: (0, 0)),
                  pl.BlockSpec((H, A), lambda i: (0, 0)),
                  pl.BlockSpec((1, A), lambda i: (0, 0))],
        out_specs=pl.BlockSpec((bm, A), lambda i: (i, 0)),
        out_shape=jax.ShapeDtypeStruct((M, A), jnp.float32),
        compiler_params=pltpu.CompilerParams(
            dimension_semantics=("parallel",)),
    )(z_flat, w2, b2, w3, b3)


# ---------------------------------------------------------------------------
# rollout wrapper: 3 phases, only phase 2 is serial
# ---------------------------------------------------------------------------
def action_model_rollout(state0, frames, params):
    """Applies ActionModel.forward over frames (T, B, O), carrying state."""
    T, B, O = frames.shape
    H = state0.shape[1]
    A = params["w3"].shape[1]

    h_all = batched_preproj(frames.reshape(T * B, O),
                            params["w1"], params["b1"]).reshape(T, B, H)
    z_all = serial_recurrence(state0, h_all,
                              params["w_ih"], params["b_ih"],
                              params["w_hh"], params["b_hh"])
    probs = batched_head(z_all.reshape(T * B, H),
                         params["w2"], params["b2"],
                         params["w3"], params["b3"]).reshape(T, B, A)
    return z_all, probs


# ---------------------------------------------------------------------------
# params / reference
# ---------------------------------------------------------------------------
def init_params(key, n_observations, n_hidden, n_actions):
    """PyTorch-style uniform +/-1/sqrt(fan_in); weights stored (in, out)."""
    def lin(k, fan_in, fan_out):
        kw, kb = jax.random.split(k)
        bound = 1.0 / jnp.sqrt(jnp.float32(fan_in))
        w = jax.random.uniform(kw, (fan_in, fan_out), jnp.float32, -bound, bound)
        b = jax.random.uniform(kb, (1, fan_out), jnp.float32, -bound, bound)
        return w, b

    k1, k2, k3, k4, k5 = jax.random.split(key, 5)
    w1, b1 = lin(k1, n_observations, n_hidden)     # linear
    w_ih, b_ih = lin(k2, n_hidden, n_hidden)       # RNNCell input->hidden
    w_hh, b_hh = lin(k3, n_hidden, n_hidden)       # RNNCell hidden->hidden
    w2, b2 = lin(k4, n_hidden, n_hidden)           # linear2
    w3, b3 = lin(k5, n_hidden, n_actions)          # linear3
    return dict(w1=w1, b1=b1, w_ih=w_ih, b_ih=b_ih, w_hh=w_hh, b_hh=b_hh,
                w2=w2, b2=b2, w3=w3, b3=b3)


def reference_forward(state, frame, p):
    h = jnp.tanh(frame @ p["w1"] + p["b1"])
    z = jnp.tanh(h @ p["w_ih"] + p["b_ih"] + state @ p["w_hh"] + p["b_hh"])
    zz = jnp.tanh(z @ p["w2"] + p["b2"])
    scores = zz @ p["w3"] + p["b3"]
    return z, jax.nn.softmax(scores, axis=-1)


# ---------------------------------------------------------------------------
if __name__ == "__main__":
    B, n_obs, n_hidden, n_actions, T = 8, 16, 32, 8, 8

    key = jax.random.PRNGKey(0)
    k_params, k_frame, k_frames = jax.random.split(key, 3)
    params = init_params(k_params, n_obs, n_hidden, n_actions)

    state = jnp.ones((B, n_hidden), jnp.float32)          # initial_state(B)
    frame = jax.random.normal(k_frame, (B, n_obs), jnp.float32)

    # --- single-step forward (module semantics) ---
    z, probs = action_model_forward(state, frame, params)
    jax.block_until_ready((z, probs))
    z_ref, probs_ref = reference_forward(state, frame, params)
    assert jnp.allclose(z, z_ref, atol=1e-5), "z mismatch vs reference"
    assert jnp.allclose(probs, probs_ref, atol=1e-5), "probs mismatch vs reference"
    assert jnp.allclose(jnp.sum(probs, axis=-1), 1.0, atol=1e-5)

    # --- 3-phase temporal rollout ---
    frames = jax.random.normal(k_frames, (T, B, n_obs), jnp.float32)
    z_all, probs_all = action_model_rollout(state, frames, params)
    jax.block_until_ready((z_all, probs_all))

    st = state
    for t in range(T):
        z_r, p_r = reference_forward(st, frames[t], params)
        assert jnp.allclose(z_all[t], z_r, atol=1e-5), f"rollout z mismatch @t={t}"
        assert jnp.allclose(probs_all[t], p_r, atol=1e-5), f"rollout probs mismatch @t={t}"
        st = z_r

    print("KERNEL_OK")
</pallas_src>

<mosaic_0001>
module attributes {stable_mosaic.version = 11 : i64} {
  func.func @action_step_kernel(%arg0: memref<8x32xf32, #tpu.memory_space<vmem>>, %arg1: memref<8x16xf32, #tpu.memory_space<vmem>>, %arg2: memref<16x32xf32, #tpu.memory_space<vmem>>, %arg3: memref<1x32xf32, #tpu.memory_space<vmem>>, %arg4: memref<32x32xf32, #tpu.memory_space<vmem>>, %arg5: memref<1x32xf32, #tpu.memory_space<vmem>>, %arg6: memref<32x32xf32, #tpu.memory_space<vmem>>, %arg7: memref<1x32xf32, #tpu.memory_space<vmem>>, %arg8: memref<32x32xf32, #tpu.memory_space<vmem>>, %arg9: memref<1x32xf32, #tpu.memory_space<vmem>>, %arg10: memref<32x8xf32, #tpu.memory_space<vmem>>, %arg11: memref<1x8xf32, #tpu.memory_space<vmem>>, %arg12: memref<8x32xf32, #tpu.memory_space<vmem>>, %arg13: memref<8x8xf32, #tpu.memory_space<vmem>>) attributes {dimension_semantics = [], scalar_prefetch = 0 : i64, scratch_operands = 0 : i64, tpu.core_type = #tpu.core_type<tc>} {
    %c0 = arith.constant 0 : index
    %c0_0 = arith.constant 0 : index
    %0 = vector.load %arg1[%c0, %c0_0] : memref<8x16xf32, #tpu.memory_space<vmem>>, vector<8x16xf32>
    %c0_1 = arith.constant 0 : index
    %c0_2 = arith.constant 0 : index
    %1 = vector.load %arg2[%c0_1, %c0_2] : memref<16x32xf32, #tpu.memory_space<vmem>>, vector<16x32xf32>
    %cst = arith.constant dense<0.000000e+00> : vector<8x32xf32>
    %2 = tpu.matmul %0, %1, %cst {dimension_numbers = #tpu.dot_dimension_numbers<[1], [0], [0], [1], [0, 0, 1, 1], [], []>} : vector<8x16xf32>, vector<16x32xf32>, vector<8x32xf32> -> vector<8x32xf32>
    %c0_3 = arith.constant 0 : index
    %c0_4 = arith.constant 0 : index
    %3 = vector.load %arg3[%c0_3, %c0_4] : memref<1x32xf32, #tpu.memory_space<vmem>>, vector<1x32xf32>
    %4 = vector.broadcast %3 : vector<1x32xf32> to vector<8x32xf32>
    %5 = arith.addf %2, %4 : vector<8x32xf32>
    %6 = math.tanh %5 : vector<8x32xf32>
    %c0_5 = arith.constant 0 : index
    %c0_6 = arith.constant 0 : index
    %7 = vector.load %arg4[%c0_5, %c0_6] : memref<32x32xf32, #tpu.memory_space<vmem>>, vector<32x32xf32>
    %cst_7 = arith.constant dense<0.000000e+00> : vector<8x32xf32>
    %8 = tpu.matmul %6, %7, %cst_7 {dimension_numbers = #tpu.dot_dimension_numbers<[1], [0], [0], [1], [0, 0, 1, 1], [], []>} : vector<8x32xf32>, vector<32x32xf32>, vector<8x32xf32> -> vector<8x32xf32>
    %c0_8 = arith.constant 0 : index
    %c0_9 = arith.constant 0 : index
    %9 = vector.load %arg0[%c0_8, %c0_9] : memref<8x32xf32, #tpu.memory_space<vmem>>, vector<8x32xf32>
    %c0_10 = arith.constant 0 : index
    %c0_11 = arith.constant 0 : index
    %10 = vector.load %arg6[%c0_10, %c0_11] : memref<32x32xf32, #tpu.memory_space<vmem>>, vector<32x32xf32>
    %cst_12 = arith.constant dense<0.000000e+00> : vector<8x32xf32>
    %11 = tpu.matmul %9, %10, %cst_12 {dimension_numbers = #tpu.dot_dimension_numbers<[1], [0], [0], [1], [0, 0, 1, 1], [], []>} : vector<8x32xf32>, vector<32x32xf32>, vector<8x32xf32> -> vector<8x32xf32>
    %12 = arith.addf %8, %11 : vector<8x32xf32>
    %c0_13 = arith.constant 0 : index
    %c0_14 = arith.constant 0 : index
    %13 = vector.load %arg5[%c0_13, %c0_14] : memref<1x32xf32, #tpu.memory_space<vmem>>, vector<1x32xf32>
    %c0_15 = arith.constant 0 : index
    %c0_16 = arith.constant 0 : index
    %14 = vector.load %arg7[%c0_15, %c0_16] : memref<1x32xf32, #tpu.memory_space<vmem>>, vector<1x32xf32>
    %15 = arith.addf %13, %14 : vector<1x32xf32>
    %16 = vector.broadcast %15 : vector<1x32xf32> to vector<8x32xf32>
    %17 = arith.addf %12, %16 : vector<8x32xf32>
    %18 = math.tanh %17 : vector<8x32xf32>
    %c0_17 = arith.constant 0 : index
    %c0_18 = arith.constant 0 : index
    %19 = vector.load %arg8[%c0_17, %c0_18] : memref<32x32xf32, #tpu.memory_space<vmem>>, vector<32x32xf32>
    %cst_19 = arith.constant dense<0.000000e+00> : vector<8x32xf32>
    %20 = tpu.matmul %18, %19, %cst_19 {dimension_numbers = #tpu.dot_dimension_numbers<[1], [0], [0], [1], [0, 0, 1, 1], [], []>} : vector<8x32xf32>, vector<32x32xf32>, vector<8x32xf32> -> vector<8x32xf32>
    %c0_20 = arith.constant 0 : index
    %c0_21 = arith.constant 0 : index
    %21 = vector.load %arg9[%c0_20, %c0_21] : memref<1x32xf32, #tpu.memory_space<vmem>>, vector<1x32xf32>
    %22 = vector.broadcast %21 : vector<1x32xf32> to vector<8x32xf32>
    %23 = arith.addf %20, %22 : vector<8x32xf32>
    %24 = math.tanh %23 : vector<8x32xf32>
    %c0_22 = arith.constant 0 : index
    %c0_23 = arith.constant 0 : index
    %25 = vector.load %arg10[%c0_22, %c0_23] : memref<32x8xf32, #tpu.memory_space<vmem>>, vector<32x8xf32>
    %cst_24 = arith.constant dense<0.000000e+00> : vector<8x8xf32>
    %26 = tpu.matmul %24, %25, %cst_24 {dimension_numbers = #tpu.dot_dimension_numbers<[1], [0], [0], [1], [0, 0, 1, 1], [], []>} : vector<8x32xf32>, vector<32x8xf32>, vector<8x8xf32> -> vector<8x8xf32>
    %c0_25 = arith.constant 0 : index
    %c0_26 = arith.constant 0 : index
    %27 = vector.load %arg11[%c0_25, %c0_26] : memref<1x8xf32, #tpu.memory_space<vmem>>, vector<1x8xf32>
    %28 = vector.broadcast %27 : vector<1x8xf32> to vector<8x8xf32>
    %29 = arith.addf %26, %28 : vector<8x8xf32>
    %c0_27 = arith.constant 0 : index
    %c0_28 = arith.constant 0 : index
    %30 = vector.load %arg12[%c0_27, %c0_28] : memref<8x32xf32, #tpu.memory_space<vmem>>, vector<8x32xf32>
    tpu.vector_store %arg12[%c0_27, %c0_28], %18 {strides = array<i32>} : memref<8x32xf32, #tpu.memory_space<vmem>>, vector<8x32xf32>,
    %cst_29 = arith.constant dense<0xFF800000> : vector<8xf32>
    %31 = vector.multi_reduction <maximumf>, %29, %cst_29 [1] : vector<8x8xf32> to vector<8xf32>
    %32 = vector.shape_cast %31 : vector<8xf32> to vector<8x1xf32>
    %33 = vector.broadcast %32 : vector<8x1xf32> to vector<8x8xf32>
    %34 = arith.subf %29, %33 : vector<8x8xf32>
    %35 = math.exp %34 : vector<8x8xf32>
    %cst_30 = arith.constant dense<0.000000e+00> : vector<8xf32>
    %36 = vector.multi_reduction <add>, %35, %cst_30 [1] : vector<8x8xf32> to vector<8xf32>
    %37 = vector.shape_cast %36 : vector<8xf32> to vector<8x1xf32>
    %38 = tpu.reciprocal %37 {approx = true} : vector<8x1xf32> -> vector<8x1xf32>
    %39 = arith.mulf %37, %38 : vector<8x1xf32>
    %cst_31 = arith.constant 2.000000e+00 : f32
    %40 = vector.broadcast %cst_31 : f32 to vector<8x1xf32>
    %41 = arith.subf %40, %39 : vector<8x1xf32>
    %42 = arith.mulf %38, %41 : vector<8x1xf32>
    %43 = vector.broadcast %42 : vector<8x1xf32> to vector<8x8xf32>
    %44 = arith.mulf %35, %43 : vector<8x8xf32>
    %c0_32 = arith.constant 0 : index
    %c0_33 = arith.constant 0 : index
    %45 = vector.load %arg13[%c0_32, %c0_33] : memref<8x8xf32, #tpu.memory_space<vmem>>, vector<8x8xf32>
    tpu.vector_store %arg13[%c0_32, %c0_33], %44 {strides = array<i32>} : memref<8x8xf32, #tpu.memory_space<vmem>>, vector<8x8xf32>,
    return
  }
}

</mosaic_0001>

<bundles_post_ra>
// kernel: tpu_custom_call.1
= control target key start
LH: loop header
LB: loop body
LE: loop exit
PB: predicated region body
PF: predicated region fallthrough
CT: control target
= control target key end

     0   :  { %19 = vsyncpa [#allocation3], 0  ;;  %s1161_s0 = inlined_call_operand.hbm [shape: f32[8,32], index: 0, kind: input, shape index: {}]   ;;  %s1162_s1 = inlined_call_operand.hbm [shape: f32[8,16], index: 1, kind: input, shape index: {}]   ;;  %s1163_s2 = inlined_call_operand.hbm [shape: f32[16,32], index: 2, kind: input, shape index: {}]   ;;  %s1164_s3 = inlined_call_operand.vmem [shape: f32[1,32], index: 3, kind: input, shape index: {}]   ;;  %s1165_s4 = inlined_call_operand.vmem [shape: f32[32,32], index: 4, kind: input, shape index: {}]   ;;  %s1166_s5 = inlined_call_operand.vmem [shape: f32[1,32], index: 5, kind: input, shape index: {}]   ;;  %s1167_s6 = inlined_call_operand.hbm [shape: f32[32,32], index: 6, kind: input, shape index: {}]   ;;  %s1168_s7 = inlined_call_operand.hbm [shape: f32[1,32], index: 7, kind: input, shape index: {}]   ;;  %s1169_s8 = inlined_call_operand.vmem [shape: f32[32,32], index: 8, kind: input, shape index: {}]   ;;  %s1170_s9 = inlined_call_operand.hbm [shape: f32[1,32], index: 9, kind: input, shape index: {}]   ;;  %s1171_s10 = inlined_call_operand.vmem [shape: f32[32,8], index: 10, kind: input, shape index: {}]   ;;  %s1172_s11 = inlined_call_operand.vmem [shape: f32[1,8], index: 11, kind: input, shape index: {}]   ;;  %s1173_s12 = inlined_call_operand.hbm [shape: f32[8,32], index: 12, kind: output, shape index: {0}]   ;;  %s1174_s13 = inlined_call_operand.hbm [shape: f32[8,8], index: 13, kind: output, shape index: {1}]  }
   0x1   :  { %20 = vsyncpa [#allocation6], 0 }
   0x2   :  { %21 = vsyncpa [#allocation9], 0 }
   0x3   :  { %22 = vsyncpa [#allocation12], 0 }
   0x4   :  { %23 = vsyncpa [#allocation4], 0 }
   0x5   :  { %24 = vsyncpa [#allocation15], 0  ;;  %s909_s25 = smov [#allocation5]   ;;  %s721_s29 = scalar_lea.hbm %s1162_s1, 128 }
   0x6   :  { %s41_s26 = sshll.u32 %s909_s25, 4  ;;  %p722_p0 = scmp.ne.s32.totalorder %s1162_s1, %s721_s29  ;;  %s42_s26 = int_to_ptr.vmem [resolvable:$true] %s41_s26 }
   0x7   :  { %p725_p1 = scmp.lt.u32.totalorder %s721_s29, %s1162_s1 }
   0x9   :  { %p727_p2 = pnand %p725_p1, %p722_p0 }
   0xb   :  { %730 = shalt.err (!%p727_p2)
}
   0xc   :  { %s731_s17 = scalar_lea.vmem %s42_s26, 128  ;;  %p736_p4 = scmp.lt.s32.totalorder %s42_s26, %s42_s26 }
   0xd   :  { %p732_p3 = scmp.ne.s32.totalorder %s42_s26, %s731_s17  ;;  %p737_p5 = scmp.lt.s32.totalorder %s731_s17, %s731_s17 }
   0xf   :  { %p738_p6 = por %p737_p5, %p736_p4 }
  0x11   :  { %p739_p7 = pnand %p738_p6, %p732_p3 }
  0x13   :  { %742 = shalt.err (!%p739_p7)
}
  0x14   :  { %44 = dma.hbm_to_vmem [thread:$0]  %s1162_s1, 128, %s42_s26, [#allocation6]  }
  0x15   :  { %s910_s20 = smov [#allocation8]   ;;  %s911_s22 = smov [#allocation2]  }
  0x16   :  { %s68_s21 = sshll.u32 %s910_s20, 4  ;;  %s31_s23 = sshll.u32 %s911_s22, 4  ;;  %s69_s21 = int_to_ptr.vmem [resolvable:$true] %s68_s21  ;;  %s32_s23 = int_to_ptr.vmem [resolvable:$true] %s31_s23 }
  0x17   :  { %s743_s27 = scalar_lea.hbm %s1167_s6, 512 }
  0x18   :  { %p744_p8 = scmp.ne.s32.totalorder %s1167_s6, %s743_s27  ;;  %p747_p9 = scmp.lt.u32.totalorder %s743_s27, %s1167_s6 }
  0x1a   :  { %p749_p10 = pnand %p747_p9, %p744_p8 }
  0x1c   :  { %752 = shalt.err (!%p749_p10)
}
  0x1d   :  { %s753_s1 = scalar_lea.vmem %s69_s21, 512  ;;  %p758_p12 = scmp.lt.s32.totalorder %s69_s21, %s69_s21 }
  0x1e   :  { %p754_p11 = scmp.ne.s32.totalorder %s69_s21, %s753_s1  ;;  %p759_p13 = scmp.lt.s32.totalorder %s753_s1, %s753_s1 }
  0x20   :  { %p760_p0 = por %p759_p13, %p758_p12 }
  0x22   :  { %p761_p1 = pnand %p760_p0, %p754_p11 }
  0x24   :  { %764 = shalt.err (!%p761_p1)
}
  0x25   :  { %s912_s26 = smov 128   ;;  %s913_s15 = smov 8  }
  0x26   :  { %74 = dma.hbm_to_vmem [thread:$0]  %s1167_s6, 512, %s69_s21, [#allocation9], %s912_s26, %s912_s26, %s913_s15  }
  0x27   :  { %s765_s20 = scalar_lea.hbm %s1161_s0, 128 }
  0x28   :  { %p766_p2 = scmp.ne.s32.totalorder %s1161_s0, %s765_s20  ;;  %p769_p3 = scmp.lt.u32.totalorder %s765_s20, %s1161_s0 }
  0x2a   :  { %p771_p4 = pnand %p769_p3, %p766_p2 }
  0x2c   :  { %774 = shalt.err (!%p771_p4)
}
  0x2d   :  { %s775_s28 = scalar_lea.vmem %s32_s23, 128  ;;  %p780_p6 = scmp.lt.s32.totalorder %s32_s23, %s32_s23 }
  0x2e   :  { %p776_p5 = scmp.ne.s32.totalorder %s32_s23, %s775_s28  ;;  %p781_p7 = scmp.lt.s32.totalorder %s775_s28, %s775_s28 }
  0x30   :  { %p782_p8 = por %p781_p7, %p780_p6 }
  0x32   :  { %p783_p9 = pnand %p782_p8, %p776_p5 }
  0x34   :  { %786 = shalt.err (!%p783_p9)
}
  0x35   :  { %34 = dma.hbm_to_vmem [thread:$0]  %s1161_s0, 128, %s32_s23, [#allocation3]  }
  0x36   :  { %s914_s29 = smov [#allocation7]   ;;  %s915_s14 = smov [#allocation10]  }
  0x37   :  { %s50_s30 = sshll.u32 %s914_s29, 4  ;;  %s81_s1 = sshll.u32 %s915_s14, 4  ;;  %s51_s30 = int_to_ptr.vmem [resolvable:$true] %s50_s30  ;;  %s82_s1 = int_to_ptr.vmem [resolvable:$true] %s81_s1 }
  0x38   :  { %s787_s18 = scalar_lea.hbm %s1163_s2, 256 }
  0x39   :  { %p788_p10 = scmp.ne.s32.totalorder %s1163_s2, %s787_s18  ;;  %p791_p11 = scmp.lt.u32.totalorder %s787_s18, %s1163_s2 }
  0x3b   :  { %p793_p12 = pnand %p791_p11, %p788_p10 }
  0x3d   :  { %796 = shalt.err (!%p793_p12)
}
  0x3e   :  { %s797_s0 = scalar_lea.vmem %s51_s30, 256  ;;  %p802_p0 = scmp.lt.s32.totalorder %s51_s30, %s51_s30 }
  0x3f   :  { %p798_p13 = scmp.ne.s32.totalorder %s51_s30, %s797_s0  ;;  %p803_p1 = scmp.lt.s32.totalorder %s797_s0, %s797_s0 }
  0x41   :  { %p804_p2 = por %p803_p1, %p802_p0 }
  0x43   :  { %p805_p3 = pnand %p804_p2, %p798_p13 }
  0x45   :  { %808 = shalt.err (!%p805_p3)
}
  0x46   :  { %56 = dma.hbm_to_vmem [thread:$0]  %s1163_s2, 256, %s51_s30, [#allocation6], %s912_s26, %s912_s26, %s913_s15  }
  0x47   :  { %s809_s6 = scalar_lea.hbm %s1168_s7, 16 }
  0x48   :  { %p810_p4 = scmp.ne.s32.totalorder %s1168_s7, %s809_s6  ;;  %p813_p5 = scmp.lt.u32.totalorder %s809_s6, %s1168_s7 }
  0x4a   :  { %p815_p6 = pnand %p813_p5, %p810_p4 }
  0x4c   :  { %818 = shalt.err (!%p815_p6)
}
  0x4d   :  { %s819_s17 = scalar_lea.vmem %s82_s1, 16  ;;  %s823_s18 = scalar_lea.vmem %s82_s1, 32 }
  0x4e   :  { %p820_p7 = scmp.ne.s32.totalorder %s82_s1, %s819_s17  ;;  %p824_p8 = scmp.lt.s32.totalorder %s82_s1, %s82_s1 }
  0x4f   :  { %p825_p9 = scmp.lt.s32.totalorder %s823_s18, %s819_s17 }
  0x51   :  { %p826_p10 = por %p825_p9, %p824_p8 }
  0x53   :  { %p827_p11 = pnand %p826_p10, %p820_p7 }
  0x55   :  { %830 = shalt.err (!%p827_p11)
}
  0x56   :  { %84 = dma.hbm_to_vmem [thread:$0]  %s1168_s7, 16, %s82_s1, [#allocation9]  }
  0x57   :  { %s916_s15 = smov [#allocation11]   ;;  %s831_s22 = scalar_lea.hbm %s1170_s9, 16 }
  0x58   :  { %s93_s30 = sshll.u32 %s916_s15, 4  ;;  %p832_p12 = scmp.ne.s32.totalorder %s1170_s9, %s831_s22  ;;  %s94_s30 = int_to_ptr.vmem [resolvable:$true] %s93_s30 }
  0x59   :  { %p835_p13 = scmp.lt.u32.totalorder %s831_s22, %s1170_s9 }
  0x5b   :  { %p837_p0 = pnand %p835_p13, %p832_p12 }
  0x5d   :  { %840 = shalt.err (!%p837_p0)
}
  0x5e   :  { %s841_s27 = scalar_lea.vmem %s94_s30, 16  ;;  %s845_s7 = scalar_lea.vmem %s94_s30, 32 }
  0x5f   :  { %p842_p1 = scmp.ne.s32.totalorder %s94_s30, %s841_s27  ;;  %p846_p2 = scmp.lt.s32.totalorder %s94_s30, %s94_s30 }
  0x60   :  { %p847_p3 = scmp.lt.s32.totalorder %s845_s7, %s841_s27 }
  0x62   :  { %p848_p4 = por %p847_p3, %p846_p2 }
  0x64   :  { %p849_p5 = pnand %p848_p4, %p842_p1 }
  0x66   :  { %852 = shalt.err (!%p849_p5)
}
  0x67   :  { %96 = dma.hbm_to_vmem [thread:$0]  %s1170_s9, 16, %s94_s30, [#allocation12]  }
  0x68   :  { %897 = dma.done.wait [#allocation3], 128  }
  0x69   :  { %898 = vsyncadd [#allocation3], 4294967168 }
  0x6a   :  { %899 = dma.done.wait [#allocation6], 384  }
  0x6b   :  { %900 = vsyncadd [#allocation6], 4294966912 }
  0x6c   :  { %901 = dma.done.wait [#allocation9], 528  }
  0x6d   :  { %902 = vsyncadd [#allocation9], 4294966768 }
  0x6e   :  { %903 = dma.done.wait [#allocation12], 16  }
  0x6f   :  { %904 = vsyncadd [#allocation12], 4294967280  ;;  %v917_v0 = vmov 0.0|0.0   ;;  %vm918_vm0 = vmmov 0   ;;  %v919_v1 = vmov 0.0   ;;  %v120_v2 = vld [vmem:[#allocation7] sm:$0xff]  ;;  %v364_v32 = vlaneseq }
  0x70   :  { %671 = vmatprep.subr.bf16.mxu0 %v917_v0  ;;  %624 = vmatprep.mubr.msk.f32.mxu0 %vm918_vm0, %v919_v1  ;;  %v121_v3 = vld [vmem:[#allocation7 + $0x8] sm:$0xff]  ;;  %v119_v5 = vld [vmem:[#allocation5] sm:$0xff]  ;;  %vm129_vm1 = vcmask 130048   ;;  %v209_v6 = vld [vmem:[#allocation8] sm:$0xff]  ;;  %vm213_vm2 = vcmask 261120   ;;  %vm541_vm3 = vcmask 64512  }
  0x71   :  { %674 = vmatprep.subr.bf16.mxu1 %v917_v0  ;;  %635 = vmatprep.mubr.msk.f32.mxu1 %vm918_vm0, %v919_v1  ;;  %v672_v4 = vpack.c.bf16 %v121_v3, %v120_v2  ;;  %v210_v7 = vld [vmem:[#allocation8 + $0x8] sm:$0xff]  ;;  %v204_v8 = vld [vmem:[%s1165_s4] sm:$0xff]  ;;  %v211_v11 = vld [vmem:[#allocation8 + $0x10] sm:$0xff]  ;;  %v365_v33 = vshrl.u32 %v364_v32, 7 }
  0x72   :  { %v675_v9 = vpack.c.bf16 %v210_v7, %v209_v6  ;;  %v205_v10 = vld [vmem:[%s1165_s4 + $0x8] sm:$0xff]  ;;  %v212_v12 = vld [vmem:[#allocation8 + $0x18] sm:$0xff]  ;;  %v206_v14 = vld [vmem:[%s1165_s4 + $0x10] sm:$0xff] }
  0x73   :  { %673 = vmatpush3.bf16.msra.mxu0 %v672_v4  ;;  %v681_v13 = vpack.c.bf16 %v205_v10, %v204_v8  ;;  %v207_v15 = vld [vmem:[%s1165_s4 + $0x18] sm:$0xff]  ;;  %v678_v16 = vpack.c.bf16 %v212_v12, %v211_v11  ;;  %v208_v18 = vld [vmem:[#allocation2] sm:$0xff]  ;;  %v372_v27 = vld [vmem:[%s1169_s8 + $0x8] sm:$0xff]  ;;  %v366_v37 = vsub.s32 0, %v365_v33 }
  0x74   :  { %680 = vmatprep.subr.bf16.mxu0 %v917_v0  ;;  %676 = vmatpush3.bf16.msra.mxu1 %v675_v9  ;;  %v684_v17 = vpack.c.bf16 %v207_v15, %v206_v14  ;;  %v589_v19 = vld [vmem:[%s1164_s3] ss:$0 sm:$0xff]  ;;  %v373_v29 = vld [vmem:[%s1169_s8 + $0x10] sm:$0xff]  ;;  %v374_v30 = vld [vmem:[%s1169_s8 + $0x18] sm:$0xff] }
  0x75   :  { %677 = vmatprep.subr.bf16.mxu1 %v917_v0  ;;  %v371_v26 = vld [vmem:[%s1169_s8] sm:$0xff]  ;;  %v690_v31 = vpack.c.bf16 %v374_v30, %v373_v29  ;;  %v457_v45 = vld [vmem:[%s1171_s10 + $0x8] sm:$0xff]  ;;  %v458_v46 = vld [vmem:[%s1171_s10 + $0x10] sm:$0xff] }
  0x76   :  { %625 = vmatmul.mubr.msk.f32.vlgmr.msra.gmra.mrb[0].mxu0 %vm129_vm1, %v119_v5  ;;  %v687_v28 = vpack.c.bf16 %v372_v27, %v371_v26  ;;  %v360_v34 = vld [vmem:[%s1166_s5] sm:$0x1]  ;;  %v459_v48 = vld [vmem:[%s1171_s10 + $0x18] sm:$0xff]  ;;  %v593_v50 = vld [vmem:[#allocation11] ss:$0 sm:$0xff] }
  0x77   :  { %646 = vmatprep.mubr.msk.f32.mxu0 %vm918_vm0, %v919_v1  ;;  %682 = vmatpush3.bf16.msra.mxu0 %v681_v13  ;;  %v361_v35 = vld [vmem:[#allocation10] sm:$0x1]  ;;  %v696_v49 = vpack.c.bf16 %v459_v48, %v458_v46 }
  0x78   :  { %683 = vmatprep.subr.bf16.mxu0 %v917_v0  ;;  %679 = vmatpush3.bf16.msra.mxu1 %v678_v16  ;;  %v362_v36 = vadd.f32 %v361_v35, %v360_v34  ;;  %v456_v44 = vld [vmem:[%s1171_s10] sm:$0xff]  ;;  %s920_s10 = smov [#allocation13]  }
  0x79   :  { %686 = vmatprep.subr.bf16.mxu1 %v917_v0  ;;  %v693_v47 = vpack.c.bf16 %v457_v45, %v456_v44  ;;  %v595_v55 = vld [vmem:[%s1172_s11] ss:$0 sm:$0xff]  ;;  %s563_s29 = sshll.u32 %s920_s10, 4  ;;  %s564_s29 = int_to_ptr.vmem [resolvable:$true] %s563_s29 }
  0x7a   :  { %v367_v38 = vrot.slane %v362_v36, %v366_v37  ;;  %s853_s14 = scalar_lea.vmem %s564_s29, 128  ;;  %p858_p7 = scmp.lt.s32.totalorder %s564_s29, %s564_s29 }
  0x7b   :  { %685 = vmatpush3.bf16.msra.mxu0 %v684_v17  ;;  %636 = vmatmul.mubr.msk.f32.vlgmr.msra.gmra.mrb[0].mxu1 %vm213_vm2, %v208_v18  ;;  %p854_p6 = scmp.ne.s32.totalorder %s564_s29, %s853_s14  ;;  %p859_p8 = scmp.lt.s32.totalorder %s853_s14, %s853_s14 }
  0x7c   :  { %692 = vmatprep.subr.bf16.mxu0 %v917_v0  ;;  %657 = vmatprep.mubr.msk.f32.mxu1 %vm918_vm0, %v919_v1 }
  0x7d   :  { %688 = vmatpush3.bf16.msra.mxu1 %v687_v28  ;;  %p860_p9 = por %p859_p8, %p858_p7 }
  0x7e   :  { %689 = vmatprep.subr.bf16.mxu1 %v917_v0 }
  0x7f   :  { %p861_p10 = pnand %p860_p9, %p854_p6 }
  0x81   :  { %691 = vmatpush3.bf16.msra.mxu1 %v690_v31 }
 0x149   :  { %v199_v20 = vpop.f32.mrb[0].mxu0 }
 0x14a   :  { %v200_v21 = vadd.f32 %v589_v19, %v199_v20  ;;  %v626_v22 = vpop.f32.mrb[1].mxu0 }
 0x14c   :  { %711 = vtanh.f32 %v200_v21 }
 0x14e   :  { %v283_v24 = vpop.f32.mrb[0].mxu1 }
 0x14f   :  { %v637_v25 = vpop.f32.mrb[1].mxu1 }
 0x156   :  { %v712_v23 = vpop.eup %711 }
 0x157   :  { %647 = vmatmul.mubr.msk.f32.vlgmr.msra.gmra.mrb[2].mxu0 %vm213_vm2, %v712_v23 }
 0x158   :  { %668 = vmatprep.mubr.msk.f32.mxu0 %vm918_vm0, %v919_v1  ;;  %694 = vmatpush3.bf16.msra.mxu0 %v693_v47 }
 0x159   :  { %695 = vmatprep.subr.bf16.mxu0 %v917_v0 }
 0x15c   :  { %697 = vmatpush3.bf16.msra.mxu0 %v696_v49 }
 0x22a   :  { %v356_v39 = vpop.f32.mrb[2].mxu0 }
 0x22b   :  { %v357_v40 = vadd.f32 %v356_v39, %v283_v24  ;;  %v648_v41 = vpop.f32.mrb[3].mxu0 }
 0x22d   :  { %v369_v42 = vadd.f32 %v367_v38, %v357_v40 }
 0x22f   :  { %713 = vtanh.f32 %v369_v42 }
 0x239   :  { %v714_v43 = vpop.eup %713 }
 0x23a   :  { %540 = vst.msk [vmem:[#allocation13] sm:$0xff] %vm213_vm2, %v714_v43  ;;  %658 = vmatmul.mubr.msk.f32.vlgmr.msra.gmra.mrb[2].mxu1 %vm213_vm2, %v714_v43 }
 0x30d   :  { %v451_v51 = vpop.f32.mrb[2].mxu1 }
 0x30e   :  { %v452_v52 = vadd.f32 %v593_v50, %v451_v51  ;;  %v659_v53 = vpop.f32.mrb[3].mxu1 }
 0x310   :  { %715 = vtanh.f32 %v452_v52 }
 0x31a   :  { %v716_v54 = vpop.eup %715 }
 0x31b   :  { %669 = vmatmul.mubr.msk.f32.vlgmr.msra.gmra.mrb[4].mxu0 %vm213_vm2, %v716_v54 }
 0x3ee   :  { %v536_v56 = vpop.f32.mrb[4].mxu0 }
 0x3ef   :  { %v537_v57 = vadd.f32 %v595_v55, %v536_v56  ;;  %v670_v58 = vpop.f32.mrb[5].mxu0 }
 0x3f1   :  { %v542_v59 = vsel %vm541_vm3, %v537_v57, -inf }
 0x3f2   :  { %543 = vmax.xlane.f32.xlu0 %v542_v59 }
 0x47f   :  { %v544_v60 = vpop.xlane.xlu0 %543 }
 0x480   :  { %v545_v61 = vsub.f32 %v537_v57, %v544_v60 }
 0x482   :  { %v546_v62 = vmul.f32 1.442695, %v545_v61 }
 0x484   :  { %717 = vpow2.f32 %v546_v62 }
 0x48e   :  { %v718_v63 = vpop.eup %717 }
 0x48f   :  { %v548_v0 = vsel %vm541_vm3, %v718_v63, 0.0 }
 0x490   :  { %549 = vadd.xlane.f32.xlu0 %v548_v0 }
 0x491   :  { %864 = shalt.err (!%p861_p10)
}
 0x492   :  { %s865_s17 = scalar_lea.hbm %s1173_s12, 128 }
 0x493   :  { %p866_p11 = scmp.ne.s32.totalorder %s1173_s12, %s865_s17  ;;  %p869_p12 = scmp.lt.u32.totalorder %s865_s17, %s1173_s12 }
 0x495   :  { %p871_p13 = pnand %p869_p12, %p866_p11 }
 0x497   :  { %874 = shalt.err (!%p871_p13)
}
 0x498   :  { %566 = dma.vmem_to_hbm [thread:$0]  %s564_s29, 128, %s1173_s12, [#allocation4]  }
 0x499   :  { %s921_s19 = smov [#allocation14]  }
 0x49a   :  { %s573_s3 = sshll.u32 %s921_s19, 4  ;;  %s574_s3 = int_to_ptr.vmem [resolvable:$true] %s573_s3 }
 0x49b   :  { %s875_s20 = scalar_lea.vmem %s574_s3, 128  ;;  %p880_p1 = scmp.lt.s32.totalorder %s574_s3, %s574_s3 }
 0x49c   :  { %p876_p0 = scmp.ne.s32.totalorder %s574_s3, %s875_s20  ;;  %p881_p2 = scmp.lt.s32.totalorder %s875_s20, %s875_s20 }
 0x49e   :  { %p882_p3 = por %p881_p2, %p880_p1 }
 0x4a0   :  { %p883_p4 = pnand %p882_p3, %p876_p0 }
 0x51d   :  { %v550_v1 = vpop.xlane.xlu0 %549 }
 0x51e   :  { %719 = vrcp.f32 %v550_v1 }
 0x528   :  { %v720_v2 = vpop.eup %719 }
 0x529   :  { %v552_v3 = vmul.f32 %v720_v2, %v550_v1 }
 0x52b   :  { %v553_v4 = vsub.f32 2.0, %v552_v3 }
 0x52d   :  { %v554_v5 = vmul.f32 %v720_v2, %v553_v4 }
 0x52f   :  { %v555_v6 = vmul.f32 %v718_v63, %v554_v5 }
 0x531   :  { %556 = vst.msk [vmem:[#allocation14] sm:$0xff] %vm541_vm3, %v555_v6 }
 0x532   :  { %886 = shalt.err (!%p883_p4)
}
 0x533   :  { %s887_s24 = scalar_lea.hbm %s1174_s13, 128 }
 0x534   :  { %p888_p5 = scmp.ne.s32.totalorder %s1174_s13, %s887_s24  ;;  %p891_p6 = scmp.lt.u32.totalorder %s887_s24, %s1174_s13 }
 0x536   :  { %p893_p7 = pnand %p891_p6, %p888_p5 }
 0x538   :  { %896 = shalt.err (!%p893_p7)
}
 0x539   :  { %576 = dma.vmem_to_hbm [thread:$0]  %s574_s3, 128, %s1174_s13, [#allocation15]  }
 0x53a   :  { %905 = dma.done.wait [#allocation4], 128  }
 0x53b   :  { %906 = vsyncadd [#allocation4], 4294967168 }
 0x53c   :  { %907 = dma.done.wait [#allocation15], 128  }
 0x53d   :  { %908 = vsyncadd [#allocation15], 4294967168 }
 0x53e   :  { %583 = vsyncpa [#allocation3], 1 }
 0x53f   :  { %584 = vsyncpa [#allocation6], 1 }
 0x540   :  { %585 = vsyncpa [#allocation9], 1 }
 0x541   :  { %586 = vsyncpa [#allocation12], 1 }
 0x542   :  { %587 = vsyncpa [#allocation4], 1 }
 0x543   :  { %588 = vsyncpa [#allocation15], 1 }

</bundles_post_ra>
